<compile_context>
chip_gen: v6e
topology: v6e:2x2x1
jax: 0.10.0
libtpu: 0.0.40
codegen_flags: <defaults>
</compile_context>

<pallas_src>
import functools
import math

import jax
import jax.numpy as jnp
from jax.experimental import pallas as pl
from jax.experimental.pallas import tpu as pltpu


_N_SLOTS = 3   # prefetch depth of the HBM gather pipeline (slots in row_buf)
_UNROLL = 8    # manual unroll factor for the per-row loops


def _round_up(x, m):
    return ((x + m - 1) // m) * m


def _sublane_multiple(dtype):
    # dtype-aware second-minor tiling multiple (f32: 8, bf16: 16, int8/fp8: 32)
    return {4: 8, 2: 16, 1: 32}.get(jnp.dtype(dtype).itemsize, 8)


def _vmem_capacity_bytes():
    try:
        info = pltpu.get_tpu_info()
        cap = getattr(info, "vmem_capacity_bytes", None)
        if cap:
            return int(cap)
    except Exception:
        pass
    return 64 * 1024 * 1024   # conservative default (v7x per-TC VMEM)


# ---------------------------------------------------------------------------
# Path 1: table resident in VMEM (small / medium vocab)
# ---------------------------------------------------------------------------
def _embedding_vmem_kernel(ids_ref, table_ref, out_ref, *,
                           tile_tokens, vocab, scale, unroll):
    # ids_ref   : (n_tok_pad,) int32 SMEM (scalar prefetch; addressing only)
    # table_ref : (vocab, d_model) VMEM, same block every grid step (resident)
    # out_ref   : (tile_tokens, d_model) VMEM output block for this grid step
    i = pl.program_id(0)
    tok_base = i * tile_tokens

    @pl.loop(0, tile_tokens // unroll)
    def _(c):
        base = c * unroll
        for u in range(unroll):        # manual unroll: id read / clip / vld / vst co-issue
            t = base + u
            row = jnp.clip(ids_ref[tok_base + t], 0, vocab - 1)
            out_ref[pl.ds(t, 1), :] = (
                table_ref[pl.ds(row, 1), :] * scale).astype(out_ref.dtype)


# ---------------------------------------------------------------------------
# Path 2: table in HBM, rows gathered by DMA (large vocab)
# ---------------------------------------------------------------------------
def _embedding_hbm_gather_kernel(ids_ref, table_hbm, out_ref, row_buf, sem, *,
                                 tile_tokens, num_tiles, vocab, scale,
                                 n_slots, unroll):
    # ids_ref   : (n_tok_pad,) int32 SMEM (scalar prefetch; addressing only)
    # table_hbm : (vocab, d_model) ref left in HBM (pl.ANY); rows DMA-gathered
    # out_ref   : (tile_tokens, d_model) VMEM output block for this grid step
    # row_buf   : (n_slots, tile_tokens, d_model) rotating VMEM scratch
    # sem       : (n_slots,) DMA semaphores (all rows of a slot share one)
    i = pl.program_id(0)
    prefetch = n_slots - 1

    def issue_tile(tile_idx, slot):
        tok_base = tile_idx * tile_tokens

        @pl.loop(0, tile_tokens // unroll)
        def _(c):
            base = c * unroll
            for u in range(unroll):    # manual unroll of descriptor issue
                t = base + u
                # PyTorch nn.Embedding raises on out-of-range ids; clamp so the
                # DMA never reads an arbitrary HBM row.
                row = jnp.clip(ids_ref[tok_base + t], 0, vocab - 1)
                pltpu.make_async_copy(
                    table_hbm.at[row], row_buf.at[slot, t], sem.at[slot]
                ).start()

    def wait_tile(slot):
        # Single wait per slot: every row DMA of this slot signals the same
        # semaphore, so one wait sized (tile_tokens, d_model) drains it.
        # (The src ref only supplies the transfer size; it is never read.)
        pltpu.make_async_copy(
            table_hbm.at[pl.ds(0, tile_tokens)], row_buf.at[slot], sem.at[slot]
        ).wait()

    # Prime the pipeline: tiles 0 .. prefetch-1 into slots 0 .. prefetch-1.
    @pl.when(i == 0)
    def _():
        for p in range(min(prefetch, num_tiles)):
            issue_tile(p, p)

    # Keep the pipeline `prefetch` tiles deep (tile k lives in slot k % n_slots).
    @pl.when(i + prefetch < num_tiles)
    def _():
        issue_tile(i + prefetch, (i + prefetch) % n_slots)

    cur = i % n_slots
    wait_tile(cur)
    out_ref[...] = (row_buf[cur] * scale).astype(out_ref.dtype)


# ---------------------------------------------------------------------------
# Wrapper
# ---------------------------------------------------------------------------
def embeddings_forward(ids, table, *, tile_tokens=None, force_hbm_gather=False):
    """Pallas equivalent of Embeddings.forward: lut(x) * sqrt(d_model)."""
    batch, seq = ids.shape
    vocab, d_model = table.shape
    n_tok = batch * seq
    scale = math.sqrt(d_model)

    itemsize = jnp.dtype(table.dtype).itemsize
    sub = _sublane_multiple(table.dtype)
    row_bytes = d_model * itemsize
    table_bytes = vocab * row_bytes
    vmem_cap = _vmem_capacity_bytes()

    # VMEM-resident fast path whenever the table fits comfortably.
    use_vmem_table = (table_bytes <= vmem_cap // 4) and not force_hbm_gather

    # ---- tile selection (dtype-aware alignment, VMEM-budgeted) -------------
    if tile_tokens is None:
        if use_vmem_table:
            budget = vmem_cap // 16                      # per-tile byte budget
            max_tile = 256
        else:
            budget = (vmem_cap // 4) // (_N_SLOTS + 2)   # scratch slots + out dbl-buf
            max_tile = 512
        cap = max(sub, min(max_tile, budget // row_bytes))
        cap = max(sub, (cap // sub) * sub)
        tile_tokens = min(cap, _round_up(n_tok, sub))
    assert tile_tokens % sub == 0, "tile_tokens must respect dtype sublane tiling"
    unroll = math.gcd(_UNROLL, tile_tokens)

    # Pad token count up to a tile multiple (pad ids index row 0; sliced off).
    n_pad = _round_up(max(n_tok, 1), tile_tokens)
    num_tiles = n_pad // tile_tokens
    ids_flat = ids.reshape(n_tok).astype(jnp.int32)
    if n_pad != n_tok:
        ids_flat = jnp.pad(ids_flat, (0, n_pad - n_tok))

    # ---- VMEM limit from actual footprint, generation-aware ceiling --------
    tile_bytes = tile_tokens * row_bytes
    if use_vmem_table:
        footprint = 2 * table_bytes + 2 * tile_bytes
    else:
        footprint = _N_SLOTS * tile_bytes + 2 * tile_bytes
    vmem_limit = int(min(vmem_cap * 3 // 4,
                         max(16 * 1024 * 1024, footprint + 8 * 1024 * 1024)))

    if use_vmem_table:
        kernel = functools.partial(
            _embedding_vmem_kernel,
            tile_tokens=tile_tokens, vocab=vocab, scale=scale, unroll=unroll)
        grid_spec = pltpu.PrefetchScalarGridSpec(
            num_scalar_prefetch=1,                # ids -> SMEM (addressing)
            grid=(num_tiles,),
            in_specs=[pl.BlockSpec((vocab, d_model), lambda i, ids: (0, 0))],
            out_specs=pl.BlockSpec((tile_tokens, d_model), lambda i, ids: (i, 0)),
            scratch_shapes=[],
        )
        # Tiles are fully independent -> shardable across v7x's 2 TensorCores.
        dims = ("parallel",)
    else:
        kernel = functools.partial(
            _embedding_hbm_gather_kernel,
            tile_tokens=tile_tokens, num_tiles=num_tiles, vocab=vocab,
            scale=scale, n_slots=_N_SLOTS, unroll=unroll)
        grid_spec = pltpu.PrefetchScalarGridSpec(
            num_scalar_prefetch=1,                # ids -> SMEM (addressing)
            grid=(num_tiles,),
            in_specs=[pl.BlockSpec(memory_space=pl.ANY)],   # table stays in HBM
            out_specs=pl.BlockSpec((tile_tokens, d_model), lambda i, ids: (i, 0)),
            scratch_shapes=[
                pltpu.VMEM((_N_SLOTS, tile_tokens, d_model), table.dtype),
                pltpu.SemaphoreType.DMA((_N_SLOTS,)),
            ],
        )
        # TODO(synk): megacore-safe priming (per-core pipeline init) would let
        # this path use "parallel" on v7x; keep the sequential pipeline for now.
        dims = ("arbitrary",)

    out_flat = pl.pallas_call(
        kernel,
        out_shape=jax.ShapeDtypeStruct((n_pad, d_model), table.dtype),
        grid_spec=grid_spec,
        compiler_params=pltpu.CompilerParams(
            dimension_semantics=dims,
            vmem_limit_bytes=vmem_limit,
        ),
    )(ids_flat, table)

    # TODO(synk): for d_model < 128 the output stores are lane-sparse; folding
    # 128 // d_model tokens into the lane dim would densify them (toy shapes only).
    return out_flat[:n_tok].reshape(batch, seq, d_model)


if __name__ == "__main__":
    key = jax.random.PRNGKey(0)

    # --- toy shapes consistent with the module: batch=2, seq=8, vocab=16, d_model=32
    d_model, vocab, batch, seq = 32, 16, 2, 8
    k_tab, k_ids = jax.random.split(key)
    # nn.Embedding default init: weight ~ N(0, 1)
    table = jax.random.normal(k_tab, (vocab, d_model), dtype=jnp.float32)
    ids = jax.random.randint(k_ids, (batch, seq), 0, vocab, dtype=jnp.int32)

    out = jax.block_until_ready(embeddings_forward(ids, table))
    ref = jnp.take(table, ids, axis=0) * math.sqrt(d_model)
    assert out.shape == (batch, seq, d_model)
    assert jnp.allclose(out, ref, atol=1e-5, rtol=1e-5)

    # --- also exercise the HBM-gather path (multi-tile + padded token count) ---
    d2, v2, b2, s2 = 128, 64, 2, 9
    k_tab2, k_ids2 = jax.random.split(k_ids)
    table2 = jax.random.normal(k_tab2, (v2, d2), dtype=jnp.float32)
    ids2 = jax.random.randint(k_ids2, (b2, s2), 0, v2, dtype=jnp.int32)
    out2 = jax.block_until_ready(
        embeddings_forward(ids2, table2, tile_tokens=8, force_hbm_gather=True))
    ref2 = jnp.take(table2, ids2, axis=0) * math.sqrt(d2)
    assert out2.shape == (b2, s2, d2)
    assert jnp.allclose(out2, ref2, atol=1e-5, rtol=1e-5)

    print("KERNEL_OK")
</pallas_src>

<mosaic_0001>
module attributes {stable_mosaic.version = 11 : i64} {
  func.func @_embedding_vmem_kernel(%arg0: i32, %arg1: memref<16xi32, #tpu.memory_space<smem>>, %arg2: memref<16x32xf32, #tpu.memory_space<vmem>>, %arg3: memref<16x32xf32, #tpu.memory_space<vmem>>) attributes {dimension_semantics = [#tpu.dimension_semantics<parallel>], iteration_bounds = array<i64: 1>, scalar_prefetch = 1 : i64, scratch_operands = 0 : i64, tpu.core_type = #tpu.core_type<tc>, window_params = [{pipeline_mode = #tpu.pipeline_mode<synchronous>, transform_indices = @transform_0, window_bounds = array<i64: 16, 32>}, {transform_indices = @transform_1, window_bounds = array<i64: 16, 32>}]} {
    %c16_i32 = arith.constant 16 : i32
    %0 = arith.muli %arg0, %c16_i32 : i32
    %c0_i32 = arith.constant 0 : i32
    %c2_i32 = arith.constant 2 : i32
    %1 = arith.addi %c0_i32, %c2_i32 : i32
    %c1_i32 = arith.constant 1 : i32
    scf.for %arg4 = %c0_i32 to %1 step %c1_i32  : i32 {
      %c1_i32_1 = arith.constant 1 : i32
      %2 = arith.muli %arg4, %c1_i32_1 : i32
      %c0_i32_2 = arith.constant 0 : i32
      %3 = arith.addi %c0_i32_2, %2 : i32
      %c8_i32 = arith.constant 8 : i32
      %4 = arith.muli %3, %c8_i32 : i32
      %c0_i32_3 = arith.constant 0 : i32
      %5 = arith.addi %4, %c0_i32_3 : i32
      %6 = arith.addi %0, %5 : i32
      %7 = arith.index_cast %6 : i32 to index
      %8 = memref.load %arg1[%7] : memref<16xi32, #tpu.memory_space<smem>>
      %c0_i32_4 = arith.constant 0 : i32
      %c15_i32 = arith.constant 15 : i32
      %9 = arith.maxsi %c0_i32_4, %8 : i32
      %10 = arith.minsi %c15_i32, %9 : i32
      %11 = arith.index_cast %10 : i32 to index
      %c0 = arith.constant 0 : index
      %12 = vector.load %arg2[%11, %c0] : memref<16x32xf32, #tpu.memory_space<vmem>>, vector<1x32xf32>
      %cst = arith.constant 5.65685415 : f32
      %13 = vector.broadcast %cst : f32 to vector<1x32xf32>
      %14 = arith.mulf %12, %13 : vector<1x32xf32>
      %15 = arith.index_cast %5 : i32 to index
      %c0_5 = arith.constant 0 : index
      %16 = vector.load %arg3[%15, %c0_5] : memref<16x32xf32, #tpu.memory_space<vmem>>, vector<1x32xf32>
      tpu.vector_store %arg3[%15, %c0_5], %14 {strides = array<i32>} : memref<16x32xf32, #tpu.memory_space<vmem>>, vector<1x32xf32>,
      %c1_i32_6 = arith.constant 1 : i32
      %17 = arith.addi %4, %c1_i32_6 : i32
      %18 = arith.addi %0, %17 : i32
      %19 = arith.index_cast %18 : i32 to index
      %20 = memref.load %arg1[%19] : memref<16xi32, #tpu.memory_space<smem>>
      %c0_i32_7 = arith.constant 0 : i32
      %c15_i32_8 = arith.constant 15 : i32
      %21 = arith.maxsi %c0_i32_7, %20 : i32
      %22 = arith.minsi %c15_i32_8, %21 : i32
      %23 = arith.index_cast %22 : i32 to index
      %c0_9 = arith.constant 0 : index
      %24 = vector.load %arg2[%23, %c0_9] : memref<16x32xf32, #tpu.memory_space<vmem>>, vector<1x32xf32>
      %cst_10 = arith.constant 5.65685415 : f32
      %25 = vector.broadcast %cst_10 : f32 to vector<1x32xf32>
      %26 = arith.mulf %24, %25 : vector<1x32xf32>
      %27 = arith.index_cast %17 : i32 to index
      %c0_11 = arith.constant 0 : index
      %28 = vector.load %arg3[%27, %c0_11] : memref<16x32xf32, #tpu.memory_space<vmem>>, vector<1x32xf32>
      tpu.vector_store %arg3[%27, %c0_11], %26 {strides = array<i32>} : memref<16x32xf32, #tpu.memory_space<vmem>>, vector<1x32xf32>,
      %c2_i32_12 = arith.constant 2 : i32
      %29 = arith.addi %4, %c2_i32_12 : i32
      %30 = arith.addi %0, %29 : i32
      %31 = arith.index_cast %30 : i32 to index
      %32 = memref.load %arg1[%31] : memref<16xi32, #tpu.memory_space<smem>>
      %c0_i32_13 = arith.constant 0 : i32
      %c15_i32_14 = arith.constant 15 : i32
      %33 = arith.maxsi %c0_i32_13, %32 : i32
      %34 = arith.minsi %c15_i32_14, %33 : i32
      %35 = arith.index_cast %34 : i32 to index
      %c0_15 = arith.constant 0 : index
      %36 = vector.load %arg2[%35, %c0_15] : memref<16x32xf32, #tpu.memory_space<vmem>>, vector<1x32xf32>
      %cst_16 = arith.constant 5.65685415 : f32
      %37 = vector.broadcast %cst_16 : f32 to vector<1x32xf32>
      %38 = arith.mulf %36, %37 : vector<1x32xf32>
      %39 = arith.index_cast %29 : i32 to index
      %c0_17 = arith.constant 0 : index
      %40 = vector.load %arg3[%39, %c0_17] : memref<16x32xf32, #tpu.memory_space<vmem>>, vector<1x32xf32>
      tpu.vector_store %arg3[%39, %c0_17], %38 {strides = array<i32>} : memref<16x32xf32, #tpu.memory_space<vmem>>, vector<1x32xf32>,
      %c3_i32 = arith.constant 3 : i32
      %41 = arith.addi %4, %c3_i32 : i32
      %42 = arith.addi %0, %41 : i32
      %43 = arith.index_cast %42 : i32 to index
      %44 = memref.load %arg1[%43] : memref<16xi32, #tpu.memory_space<smem>>
      %c0_i32_18 = arith.constant 0 : i32
      %c15_i32_19 = arith.constant 15 : i32
      %45 = arith.maxsi %c0_i32_18, %44 : i32
      %46 = arith.minsi %c15_i32_19, %45 : i32
      %47 = arith.index_cast %46 : i32 to index
      %c0_20 = arith.constant 0 : index
      %48 = vector.load %arg2[%47, %c0_20] : memref<16x32xf32, #tpu.memory_space<vmem>>, vector<1x32xf32>
      %cst_21 = arith.constant 5.65685415 : f32
      %49 = vector.broadcast %cst_21 : f32 to vector<1x32xf32>
      %50 = arith.mulf %48, %49 : vector<1x32xf32>
      %51 = arith.index_cast %41 : i32 to index
      %c0_22 = arith.constant 0 : index
      %52 = vector.load %arg3[%51, %c0_22] : memref<16x32xf32, #tpu.memory_space<vmem>>, vector<1x32xf32>
      tpu.vector_store %arg3[%51, %c0_22], %50 {strides = array<i32>} : memref<16x32xf32, #tpu.memory_space<vmem>>, vector<1x32xf32>,
      %c4_i32 = arith.constant 4 : i32
      %53 = arith.addi %4, %c4_i32 : i32
      %54 = arith.addi %0, %53 : i32
      %55 = arith.index_cast %54 : i32 to index
      %56 = memref.load %arg1[%55] : memref<16xi32, #tpu.memory_space<smem>>
      %c0_i32_23 = arith.constant 0 : i32
      %c15_i32_24 = arith.constant 15 : i32
      %57 = arith.maxsi %c0_i32_23, %56 : i32
      %58 = arith.minsi %c15_i32_24, %57 : i32
      %59 = arith.index_cast %58 : i32 to index
      %c0_25 = arith.constant 0 : index
      %60 = vector.load %arg2[%59, %c0_25] : memref<16x32xf32, #tpu.memory_space<vmem>>, vector<1x32xf32>
      %cst_26 = arith.constant 5.65685415 : f32
      %61 = vector.broadcast %cst_26 : f32 to vector<1x32xf32>
      %62 = arith.mulf %60, %61 : vector<1x32xf32>
      %63 = arith.index_cast %53 : i32 to index
      %c0_27 = arith.constant 0 : index
      %64 = vector.load %arg3[%63, %c0_27] : memref<16x32xf32, #tpu.memory_space<vmem>>, vector<1x32xf32>
      tpu.vector_store %arg3[%63, %c0_27], %62 {strides = array<i32>} : memref<16x32xf32, #tpu.memory_space<vmem>>, vector<1x32xf32>,
      %c5_i32 = arith.constant 5 : i32
      %65 = arith.addi %4, %c5_i32 : i32
      %66 = arith.addi %0, %65 : i32
      %67 = arith.index_cast %66 : i32 to index
      %68 = memref.load %arg1[%67] : memref<16xi32, #tpu.memory_space<smem>>
      %c0_i32_28 = arith.constant 0 : i32
      %c15_i32_29 = arith.constant 15 : i32
      %69 = arith.maxsi %c0_i32_28, %68 : i32
      %70 = arith.minsi %c15_i32_29, %69 : i32
      %71 = arith.index_cast %70 : i32 to index
      %c0_30 = arith.constant 0 : index
      %72 = vector.load %arg2[%71, %c0_30] : memref<16x32xf32, #tpu.memory_space<vmem>>, vector<1x32xf32>
      %cst_31 = arith.constant 5.65685415 : f32
      %73 = vector.broadcast %cst_31 : f32 to vector<1x32xf32>
      %74 = arith.mulf %72, %73 : vector<1x32xf32>
      %75 = arith.index_cast %65 : i32 to index
      %c0_32 = arith.constant 0 : index
      %76 = vector.load %arg3[%75, %c0_32] : memref<16x32xf32, #tpu.memory_space<vmem>>, vector<1x32xf32>
      tpu.vector_store %arg3[%75, %c0_32], %74 {strides = array<i32>} : memref<16x32xf32, #tpu.memory_space<vmem>>, vector<1x32xf32>,
      %c6_i32 = arith.constant 6 : i32
      %77 = arith.addi %4, %c6_i32 : i32
      %78 = arith.addi %0, %77 : i32
      %79 = arith.index_cast %78 : i32 to index
      %80 = memref.load %arg1[%79] : memref<16xi32, #tpu.memory_space<smem>>
      %c0_i32_33 = arith.constant 0 : i32
      %c15_i32_34 = arith.constant 15 : i32
      %81 = arith.maxsi %c0_i32_33, %80 : i32
      %82 = arith.minsi %c15_i32_34, %81 : i32
      %83 = arith.index_cast %82 : i32 to index
      %c0_35 = arith.constant 0 : index
      %84 = vector.load %arg2[%83, %c0_35] : memref<16x32xf32, #tpu.memory_space<vmem>>, vector<1x32xf32>
      %cst_36 = arith.constant 5.65685415 : f32
      %85 = vector.broadcast %cst_36 : f32 to vector<1x32xf32>
      %86 = arith.mulf %84, %85 : vector<1x32xf32>
      %87 = arith.index_cast %77 : i32 to index
      %c0_37 = arith.constant 0 : index
      %88 = vector.load %arg3[%87, %c0_37] : memref<16x32xf32, #tpu.memory_space<vmem>>, vector<1x32xf32>
      tpu.vector_store %arg3[%87, %c0_37], %86 {strides = array<i32>} : memref<16x32xf32, #tpu.memory_space<vmem>>, vector<1x32xf32>,
      %c7_i32 = arith.constant 7 : i32
      %89 = arith.addi %4, %c7_i32 : i32
      %90 = arith.addi %0, %89 : i32
      %91 = arith.index_cast %90 : i32 to index
      %92 = memref.load %arg1[%91] : memref<16xi32, #tpu.memory_space<smem>>
      %c0_i32_38 = arith.constant 0 : i32
      %c15_i32_39 = arith.constant 15 : i32
      %93 = arith.maxsi %c0_i32_38, %92 : i32
      %94 = arith.minsi %c15_i32_39, %93 : i32
      %95 = arith.index_cast %94 : i32 to index
      %c0_40 = arith.constant 0 : index
      %96 = vector.load %arg2[%95, %c0_40] : memref<16x32xf32, #tpu.memory_space<vmem>>, vector<1x32xf32>
      %cst_41 = arith.constant 5.65685415 : f32
      %97 = vector.broadcast %cst_41 : f32 to vector<1x32xf32>
      %98 = arith.mulf %96, %97 : vector<1x32xf32>
      %99 = arith.index_cast %89 : i32 to index
      %c0_42 = arith.constant 0 : index
      %100 = vector.load %arg3[%99, %c0_42] : memref<16x32xf32, #tpu.memory_space<vmem>>, vector<1x32xf32>
      tpu.vector_store %arg3[%99, %c0_42], %98 {strides = array<i32>} : memref<16x32xf32, #tpu.memory_space<vmem>>, vector<1x32xf32>,
    }
    %c2_i32_0 = arith.constant 2 : i32
    return
  }
  func.func @transform_0(%arg0: i32, %arg1: memref<16xi32, #tpu.memory_space<smem>>) -> (i32, i32) {
    %c0_i32 = arith.constant 0 : i32
    %c0_i32_0 = arith.constant 0 : i32
    %c0_i32_1 = arith.constant 0 : i32
    return %c0_i32, %c0_i32_0 : i32, i32
  }
  func.func @transform_1(%arg0: i32, %arg1: memref<16xi32, #tpu.memory_space<smem>>) -> (i32, i32) {
    %c0_i32 = arith.constant 0 : i32
    %c0_i32_0 = arith.constant 0 : i32
    return %arg0, %c0_i32 : i32, i32
  }
}

</mosaic_0001>

<bundles_post_ra>
// kernel: tpu_custom_call.1
= control target key start
LH: loop header
LB: loop body
LE: loop exit
PB: predicated region body
PF: predicated region fallthrough
CT: control target
= control target key end

     0   :  { %s331_s9 = smov [#allocation3]   ;;  %s428_s0 = inlined_call_operand.hbm [shape: s32[16], index: 0, kind: input, shape index: {}]   ;;  %s429_s1 = inlined_call_operand.hbm [shape: f32[16,32], index: 1, kind: input, shape index: {}]   ;;  %s430_s2 = inlined_call_operand.hbm [shape: f32[16,32], index: 2, kind: output, shape index: {}]  }
   0x1   :  { %8 = dma.hbm_to_smem %s428_s0, 16, %s331_s9, [#allocation2] }
   0x2   :  { %321 = dma.done.wait [#allocation2], 16 }
   0x3   :  { %322 = vsyncadd [#allocation2], 4294967280 }
   0x4   :  { %10 = sfence }
   0x5   :  { %11 = vsyncpa [#allocation5], 0 }
   0x6   :  { %12 = vsyncpa [#allocation6], 0  ;;  %s332_s12 = smov [#allocation4]  }
   0x7   :  { %s18_s13 = sshll.u32 %s332_s12, 4  ;;  %s19_s13 = int_to_ptr.vmem [resolvable:$true] %s18_s13 }
   0x8   :  { %s285_s14 = scalar_lea.vmem %s19_s13, 256  ;;  %p290_p1 = scmp.lt.s32.totalorder %s19_s13, %s19_s13 }
   0x9   :  { %p286_p0 = scmp.ne.s32.totalorder %s19_s13, %s285_s14  ;;  %p291_p2 = scmp.lt.s32.totalorder %s285_s14, %s285_s14 }
   0xb   :  { %p292_p3 = por %p291_p2, %p290_p1 }
   0xd   :  { %p293_p4 = pnand %p292_p3, %p286_p0 }
   0xf   :  { %296 = shalt.err (!%p293_p4)
}
  0x10   :  { %s333_s15 = smov 128   ;;  %s334_s16 = smov 8  }
  0x11   :  { %24 = dma.hbm_to_vmem [thread:$0]  %s429_s1, 256, %s19_s13, [#allocation5], %s333_s15, %s333_s15, %s334_s16  }
  0x12   :  { %323 = dma.done.wait [#allocation5], 256  }
  0x13   :  { %324 = vsyncadd [#allocation5], 4294967040  ;;  %s360_s18 = smov 0  }
  0x14 LB: > { %s366_s19 = sshll.u32 %s329_s18, 3  ;;  %vm46_vm0 = vcmask 253952   ;;  %s34_s18 = sadd.s32 1, %s329_s18   ;;  %s329_s18 = sphi %s360_s18, %s34_s18  }
  0x15   : > { %s37_s1 = sld [smem:[#allocation3 + %s366_s19]]  ;;  %s48_s20 = sadd.s32 1, %s366_s19 }
  0x16   : > { %s60_s21 = sadd.s32 2, %s366_s19  ;;  %s50_s22 = sld [smem:[#allocation3 + %s48_s20]] }
  0x17   : > { %s72_s23 = sadd.s32 3, %s366_s19  ;;  %s372_s24 = sld [smem:[#allocation3 + %s60_s21]] }
  0x18   : > { %s84_s25 = sadd.s32 4, %s366_s19  ;;  %s375_s26 = sld [smem:[#allocation3 + %s72_s23]] }
  0x19   : > { %s96_s27 = sadd.s32 5, %s366_s19  ;;  %s378_s28 = sld [smem:[#allocation3 + %s84_s25]] }
  0x1a   : > { %s108_s29 = sadd.s32 6, %s366_s19  ;;  %s381_s30 = sld [smem:[#allocation3 + %s96_s27]] }
  0x1b   : > { %p38_p5 = scmp.gt.s32.totalorder %s37_s1, 0  ;;  %p186_p6 = scmp.lt.s32.totalorder %s37_s1, 15 }
  0x1c   : > { %s120_s3 = sadd.s32 7, %s366_s19  ;;  %p51_p7 = scmp.gt.s32.totalorder %s50_s22, 0 }
  0x1d   : > { %s432_s1 = smov (!%p38_p5, %s37_s1), 0  ;;  %p191_p8 = scmp.lt.s32.totalorder %s50_s22, 15 }
  0x1e   : > { %s434_s1 = smov (!%p186_p6, %s432_s1), 15  ;;  %s436_s22 = smov (!%p51_p7, %s50_s22), 0 }
  0x1f   : > { %p63_p9 = scmp.gt.s32.totalorder %s372_s24, 0  ;;  %s42_s4 = scalar_lea.vmem [#allocation4], %s434_s1 }
  0x20   : > { %v43_v0 = vld [vmem:[%s42_s4] sm:$0x1]  ;;  %s438_s22 = smov (!%p191_p8, %s436_s22), 15  ;;  %p198_p10 = scmp.lt.s32.totalorder %s372_s24, 15 }
  0x21   : > { %v44_v1 = vmul.f32 5.656854, %v43_v0  ;;  %s64_s5 = scalar_select %p63_p9, %s372_s24, 0 }
  0x22   : > { %s388_s6 = scalar_lea.vmem [#allocation7], %s366_s19  ;;  %s55_s7 = scalar_lea.vmem [#allocation4], %s438_s22 }
  0x23   : > { %47 = vst.msk [vmem:[%s388_s6] sm:$0x1] %vm46_vm0, %v44_v1  ;;  %v56_v2 = vld [vmem:[%s55_s7] sm:$0x1]  ;;  %p75_p11 = scmp.gt.s32.totalorder %s375_s26, 0  ;;  %p205_p12 = scmp.lt.s32.totalorder %s375_s26, 15 }
  0x24   : > { %v57_v3 = vmul.f32 5.656854, %v56_v2  ;;  %s440_s5 = smov (!%p198_p10, %s64_s5), 15  ;;  %p87_p13 = scmp.gt.s32.totalorder %s378_s28, 0 }
  0x25   : > { %s442_s26 = smov (!%p75_p11, %s375_s26), 0  ;;  %s67_s8 = scalar_lea.vmem [#allocation4], %s440_s5 }
  0x26   : > { %197 = vst.msk [vmem:[%s388_s6 + $0x1] sm:$0x1] %vm46_vm0, %v57_v3  ;;  %v68_v4 = vld [vmem:[%s67_s8] sm:$0x1]  ;;  %s444_s26 = smov (!%p205_p12, %s442_s26), 15  ;;  %p212_p0 = scmp.lt.s32.totalorder %s378_s28, 15 }
  0x27   : > { %v69_v5 = vmul.f32 5.656854, %v68_v4  ;;  %s88_s9 = scalar_select %p87_p13, %s378_s28, 0 }
  0x28   : > { %s79_s10 = scalar_lea.vmem [#allocation4], %s444_s26  ;;  %p99_p1 = scmp.gt.s32.totalorder %s381_s30, 0 }
  0x29   : > { %204 = vst.msk [vmem:[%s388_s6 + $0x2] sm:$0x1] %vm46_vm0, %v69_v5  ;;  %v80_v6 = vld [vmem:[%s79_s10] sm:$0x1]  ;;  %p219_p2 = scmp.lt.s32.totalorder %s381_s30, 15  ;;  %s446_s9 = smov (!%p212_p0, %s88_s9), 15 }
  0x2a   : > { %v81_v7 = vmul.f32 5.656854, %v80_v6  ;;  %s448_s30 = smov (!%p99_p1, %s381_s30), 0  ;;  %s110_s11 = sld [smem:[#allocation3 + %s108_s29]] }
  0x2b   : > { %s91_s12 = scalar_lea.vmem [#allocation4], %s446_s9  ;;  %s450_s30 = smov (!%p219_p2, %s448_s30), 15 }
  0x2c   : > { %211 = vst.msk [vmem:[%s388_s6 + $0x3] sm:$0x1] %vm46_vm0, %v81_v7  ;;  %v92_v8 = vld [vmem:[%s91_s12] sm:$0x1]  ;;  %s122_s13 = sld [smem:[#allocation3 + %s120_s3]]  ;;  %s103_s14 = scalar_lea.vmem [#allocation4], %s450_s30 }
  0x2d   : > { %v93_v9 = vmul.f32 5.656854, %v92_v8  ;;  %v104_v10 = vld [vmem:[%s103_s14] sm:$0x1]  ;;  %p31_p7 = scmp.ge.s32.totalorder %s34_s18, 2  }
  0x2e   : > { %v105_v11 = vmul.f32 5.656854, %v104_v10  ;;  %s335_s19 = smov (%p31_p7), [#allocation7]  }
  0x2f   : > { %218 = vst.msk [vmem:[%s388_s6 + $0x4] sm:$0x1] %vm46_vm0, %v93_v9  ;;  %s137_s1 = sshll.u32 (%p31_p7), %s335_s19, 4  ;;  %s138_s1 = int_to_ptr.vmem [resolvable:$true] %s137_s1 }
  0x30   : > { %p111_p3 = scmp.gt.s32.totalorder %s110_s11, 0  ;;  %p226_p4 = scmp.lt.s32.totalorder %s110_s11, 15  ;;  %225 = vst.msk [vmem:[%s388_s6 + $0x5] sm:$0x1] %vm46_vm0, %v105_v11 }
  0x31   :  { %s297_s20 = scalar_lea.vmem (%p31_p7), %s138_s1, 256  ;;  %p302_p9 = scmp.lt.s32.totalorder (%p31_p7), %s138_s1, %s138_s1 }
  0x32   : > { %s452_s11 = smov (!%p111_p3, %s110_s11), 0  ;;  %p123_p5 = scmp.gt.s32.totalorder %s122_s13, 0 }
  0x33   : > { %p233_p6 = scmp.lt.s32.totalorder %s122_s13, 15  ;;  %s454_s11 = smov (!%p226_p4, %s452_s11), 15 }
  0x34   : > { %s456_s13 = smov (!%p123_p5, %s122_s13), 0  ;;  %s115_s0 = scalar_lea.vmem [#allocation4], %s454_s11 }
  0x35   : > { %v116_v12 = vld [vmem:[%s115_s0] sm:$0x1]  ;;  %s458_s13 = smov (!%p233_p6, %s456_s13), 15  ;;  %p298_p8 = scmp.ne.s32.totalorder (%p31_p7), %s138_s1, %s297_s20 }
  0x36   : > { %v117_v13 = vmul.f32 5.656854, %v116_v12  ;;  %s127_s17 = scalar_lea.vmem [#allocation4], %s458_s13  ;;  %33 = sbr.rel (!%p31_p7) target bundleno = 20 (0x14), region = 51 }
  0x37   : > { %v128_v14 = vld [vmem:[%s127_s17] sm:$0x1]  ;;  %p303_p10 = scmp.lt.s32.totalorder (%p31_p7), %s297_s20, %s297_s20 }
  0x38   : > { %232 = vst.msk [vmem:[%s388_s6 + $0x6] sm:$0x1] %vm46_vm0, %v117_v13  ;;  %v129_v15 = vmul.f32 5.656854, %v128_v14 }
  0x39   :  { %p304_p11 = por (%p31_p7), %p303_p10, %p302_p9 }
  0x3a   : > { %239 = vst.msk [vmem:[%s388_s6 + $0x7] sm:$0x1] %vm46_vm0, %v129_v15 }
  0x3b   :  { %p305_p12 = pnand %p304_p11, %p298_p8 }
  0x3d   :  { %308 = shalt.err (!%p305_p12)
}
  0x3e   :  { %143 = dma.vmem_to_hbm [thread:$0]  %s138_s1, 256, %s430_s2, [#allocation6], %s333_s15, %s333_s15, %s334_s16  }
  0x3f   :  { %325 = dma.done.wait [#allocation6], 256  }
  0x40   :  { %326 = vsyncadd [#allocation6], 4294967040 }
  0x41   :  { %147 = vsyncpa [#allocation5], 1 }
  0x42   :  { %148 = vsyncpa [#allocation6], 1 }

</bundles_post_ra>
